<compile_context>
chip_gen: v6e
topology: v6e:2x2x1
jax: 0.10.0
libtpu: 0.0.40
codegen_flags: <defaults>
</compile_context>

<pallas_src>
import functools

import jax
import jax.numpy as jnp
from jax.experimental import pallas as pl
from jax.experimental.pallas import tpu as pltpu


def _round_up(x, m):
    return ((x + m - 1) // m) * m


# ----------------------------------------------------------------------------- kernel


def stacked_ae_kernel(x_ref,
                      w1_ref, b1_ref,
                      w2_ref, b2_ref,
                      w3_ref, b3_ref,
                      w4_ref, b4_ref,
                      w5_ref, b5_ref,
                      o_ref):
    # x tile: [TB, M_pad] in the streaming dtype (bf16 by default).
    x = x_ref[...]

    # fc1 (big, MXU): bf16 x bf16 -> f32 accumulation; bias add + sigmoid in f32.
    h = jax.nn.sigmoid(
        jnp.dot(x, w1_ref[...], preferred_element_type=jnp.float32) + b1_ref[...])
    # fc2..fc4: tiny (20/10 wide), kept in f32; negligible vs. the x/y DMA.
    h = jax.nn.sigmoid(
        jnp.dot(h, w2_ref[...], preferred_element_type=jnp.float32) + b2_ref[...])
    h = jax.nn.sigmoid(
        jnp.dot(h, w3_ref[...], preferred_element_type=jnp.float32) + b3_ref[...])
    h = jax.nn.sigmoid(
        jnp.dot(h, w4_ref[...], preferred_element_type=jnp.float32) + b4_ref[...])
    # fc5 (big, MXU): feed the MXU its native bf16 inputs, accumulate in f32.
    w5 = w5_ref[...]
    y = jnp.dot(h.astype(w5.dtype), w5,
                preferred_element_type=jnp.float32) + b5_ref[...]

    o_ref[...] = y.astype(o_ref.dtype)


# ---------------------------------------------------------------- tiling / VMEM budget


def _tpu_vmem_config():
    """Returns (stream+resident VMEM budget, vmem_limit_bytes, TensorCores/chip)."""
    try:
        kind = jax.devices()[0].device_kind.lower()
    except Exception:  # pragma: no cover - no device info available
        kind = ""
    if "v7" in kind or "7x" in kind:
        # 64 MiB physical VMEM shared by 2 TensorCores.
        return 40 << 20, 56 << 20, 2
    if any(g in kind for g in ("v6", "v5", "v4")):
        # 128 MiB physical VMEM, single TensorCore per chip.
        return 96 << 20, 112 << 20, 1
    # Unknown generation: assume the most constrained (v7x-like) configuration.
    return 40 << 20, 56 << 20, 2


def _vmem_padded_bytes(shape, dtype):
    """Approximate VMEM footprint of a 2-D operand ((sublane, 128)-tile padded)."""
    itemsize = jnp.dtype(dtype).itemsize
    sublane = 8 * max(4 // itemsize, 1)          # 8 for f32, 16 for bf16
    rows = _round_up(shape[0], sublane)
    cols = _round_up(shape[1], 128)
    return rows * cols * itemsize


def _choose_batch_tile(B, M_pad, stream_itemsize, out_itemsize,
                       stream_budget_bytes, num_cores):
    """Largest batch tile whose double-buffered x/out streams fit the budget."""
    sub = 8 * max(4 // min(stream_itemsize, out_itemsize), 1)   # sublane-dense tiles
    b_padded = _round_up(B, sub)
    per_row = 2 * M_pad * (stream_itemsize + out_itemsize)      # 2 pipeline buffers
    tb = max(stream_budget_bytes // per_row, sub)
    tb = max((tb // sub) * sub, sub)
    tb = min(tb, 2048)            # diminishing returns; bounds batch padding
    tb = min(tb, b_padded)
    # Guarantee >= 2 grid tiles on 2-TensorCore chips (v7x) so the "parallel"
    # batch axis actually puts work on both cores.
    if num_cores >= 2 and b_padded > sub and pl.cdiv(b_padded, tb) < 2:
        tb = _round_up(pl.cdiv(b_padded, 2), sub)
    return int(tb)


def _const_spec(shape):
    # Per-argument factory (no late-binding lambda bug); constant block index
    # across the batch grid keeps the operand VMEM-resident (DMA'd once).
    return pl.BlockSpec(shape, lambda i: (0,) * len(shape))


# ----------------------------------------------------------------------------- wrapper


def stacked_ae_forward(x, params, *,
                       stream_dtype=jnp.bfloat16,
                       out_dtype=jnp.bfloat16):
    """StackedAE forward.

    x: [B, nb_movies] float32.  params: w1..w5 as [in, out] and b1..b5 as [1, out].
    Returns [B, nb_movies] in `out_dtype` (bf16 by default to halve HBM writes).
    """
    B, M = x.shape
    M_pad = _round_up(M, 128)                     # lane-dense loads/stores
    stream_dtype = jnp.dtype(stream_dtype)
    out_dtype = jnp.dtype(out_dtype)

    def pad2(a, rows, cols):
        return jnp.pad(a, ((0, rows - a.shape[0]), (0, cols - a.shape[1])))

    # Zero padding is exact: padded x columns hit zero rows of w1; padded w5
    # columns / b5 entries are zero and get sliced off the output.
    w1 = pad2(params["w1"], M_pad, params["w1"].shape[1]).astype(stream_dtype)
    w5 = pad2(params["w5"], params["w5"].shape[0], M_pad).astype(stream_dtype)
    b5 = pad2(params["b5"], 1, M_pad)

    const_args = (w1, params["b1"],
                  params["w2"], params["b2"],
                  params["w3"], params["b3"],
                  params["w4"], params["b4"],
                  w5, b5)

    budget, vmem_limit, num_cores = _tpu_vmem_config()
    # Default pipelining double-buffers every operand, including the resident ones.
    resident = 2 * sum(_vmem_padded_bytes(a.shape, a.dtype) for a in const_args)
    stream_budget = max(budget - resident, 1 << 20)

    TB = _choose_batch_tile(B, M_pad, stream_dtype.itemsize, out_dtype.itemsize,
                            stream_budget, num_cores)
    B_pad = _round_up(B, TB)
    x_p = pad2(x, B_pad, M_pad).astype(stream_dtype)

    in_specs = [pl.BlockSpec((TB, M_pad), lambda i: (i, 0))]     # x: batch-tiled
    in_specs += [_const_spec(a.shape) for a in const_args]       # VMEM-resident
    out_spec = pl.BlockSpec((TB, M_pad), lambda i: (i, 0))

    out = pl.pallas_call(
        stacked_ae_kernel,
        out_shape=jax.ShapeDtypeStruct((B_pad, M_pad), out_dtype),
        grid=(B_pad // TB,),
        in_specs=in_specs,
        out_specs=out_spec,
        compiler_params=pltpu.CompilerParams(
            dimension_semantics=("parallel",),   # shard batch tiles across TCs (v7x)
            vmem_limit_bytes=vmem_limit,         # generation-gated VMEM ceiling
        ),
    )(x_p, *const_args)

    return out[:B, :M]


# --------------------------------------------------------------------------- utilities


def init_params(key, nb_movies):
    """Deterministic PyTorch-style init: U(-1/sqrt(fan_in), 1/sqrt(fan_in))."""
    dims = [(nb_movies, 20), (20, 10), (10, 10), (10, 20), (20, nb_movies)]
    params = {}
    for i, (fan_in, fan_out) in enumerate(dims, start=1):
        key, kw, kb = jax.random.split(key, 3)
        bound = 1.0 / jnp.sqrt(jnp.float32(fan_in))
        params[f"w{i}"] = jax.random.uniform(
            kw, (fan_in, fan_out), jnp.float32, -bound, bound)
        params[f"b{i}"] = jax.random.uniform(
            kb, (1, fan_out), jnp.float32, -bound, bound)
    return params


def reference_forward(x, params):
    dot = functools.partial(jnp.dot, precision=jax.lax.Precision.HIGHEST)
    h = jax.nn.sigmoid(dot(x, params["w1"]) + params["b1"])
    h = jax.nn.sigmoid(dot(h, params["w2"]) + params["b2"])
    h = jax.nn.sigmoid(dot(h, params["w3"]) + params["b3"])
    h = jax.nn.sigmoid(dot(h, params["w4"]) + params["b4"])
    return dot(h, params["w5"]) + params["b5"]


if __name__ == "__main__":
    key = jax.random.PRNGKey(0)
    batch = 6          # deliberately not a multiple of 8   -> exercises batch padding
    nb_movies = 200    # deliberately not a multiple of 128 -> exercises lane padding

    key, kx = jax.random.split(key)
    x = jax.random.uniform(kx, (batch, nb_movies), jnp.float32)  # ratings in [0, 1]
    params = init_params(key, nb_movies)

    out = stacked_ae_forward(x, params)          # bf16-streamed by default
    out = jax.block_until_ready(out)

    ref = reference_forward(x, params)           # f32 / HIGHEST-precision reference
    assert out.shape == (batch, nb_movies)
    assert jnp.allclose(out.astype(jnp.float32), ref, atol=2e-2, rtol=2e-2), \
        "mismatch vs JAX reference"

    print("KERNEL_OK")
</pallas_src>

<mosaic_0001>
module attributes {stable_mosaic.version = 11 : i64} {
  func.func @stacked_ae_kernel(%arg0: i32, %arg1: memref<16x256xbf16, #tpu.memory_space<vmem>>, %arg2: memref<256x20xbf16, #tpu.memory_space<vmem>>, %arg3: memref<1x20xf32, #tpu.memory_space<vmem>>, %arg4: memref<20x10xf32, #tpu.memory_space<vmem>>, %arg5: memref<1x10xf32, #tpu.memory_space<vmem>>, %arg6: memref<10x10xf32, #tpu.memory_space<vmem>>, %arg7: memref<1x10xf32, #tpu.memory_space<vmem>>, %arg8: memref<10x20xf32, #tpu.memory_space<vmem>>, %arg9: memref<1x20xf32, #tpu.memory_space<vmem>>, %arg10: memref<20x256xbf16, #tpu.memory_space<vmem>>, %arg11: memref<1x256xf32, #tpu.memory_space<vmem>>, %arg12: memref<16x256xbf16, #tpu.memory_space<vmem>>) attributes {dimension_semantics = [#tpu.dimension_semantics<parallel>], iteration_bounds = array<i64: 1>, scalar_prefetch = 0 : i64, scratch_operands = 0 : i64, tpu.core_type = #tpu.core_type<tc>, window_params = [{transform_indices = @transform_0, window_bounds = array<i64: 16, 256>}, {pipeline_mode = #tpu.pipeline_mode<synchronous>, transform_indices = @transform_1, window_bounds = array<i64: 256, 20>}, {pipeline_mode = #tpu.pipeline_mode<synchronous>, transform_indices = @transform_2, window_bounds = array<i64: 1, 20>}, {pipeline_mode = #tpu.pipeline_mode<synchronous>, transform_indices = @transform_3, window_bounds = array<i64: 20, 10>}, {pipeline_mode = #tpu.pipeline_mode<synchronous>, transform_indices = @transform_4, window_bounds = array<i64: 1, 10>}, {pipeline_mode = #tpu.pipeline_mode<synchronous>, transform_indices = @transform_5, window_bounds = array<i64: 10, 10>}, {pipeline_mode = #tpu.pipeline_mode<synchronous>, transform_indices = @transform_6, window_bounds = array<i64: 1, 10>}, {pipeline_mode = #tpu.pipeline_mode<synchronous>, transform_indices = @transform_7, window_bounds = array<i64: 10, 20>}, {pipeline_mode = #tpu.pipeline_mode<synchronous>, transform_indices = @transform_8, window_bounds = array<i64: 1, 20>}, {pipeline_mode = #tpu.pipeline_mode<synchronous>, transform_indices = @transform_9, window_bounds = array<i64: 20, 256>}, {pipeline_mode = #tpu.pipeline_mode<synchronous>, transform_indices = @transform_10, window_bounds = array<i64: 1, 256>}, {transform_indices = @transform_11, window_bounds = array<i64: 16, 256>}]} {
    %c0 = arith.constant 0 : index
    %c0_0 = arith.constant 0 : index
    %0 = vector.load %arg1[%c0, %c0_0] : memref<16x256xbf16, #tpu.memory_space<vmem>>, vector<16x256xbf16>
    %c0_1 = arith.constant 0 : index
    %c0_2 = arith.constant 0 : index
    %1 = vector.load %arg2[%c0_1, %c0_2] : memref<256x20xbf16, #tpu.memory_space<vmem>>, vector<256x20xbf16>
    %cst = arith.constant dense<0.000000e+00> : vector<16x20xf32>
    %2 = tpu.matmul %0, %1, %cst {dimension_numbers = #tpu.dot_dimension_numbers<[1], [0], [0], [1], [0, 0, 1, 1], [], []>} : vector<16x256xbf16>, vector<256x20xbf16>, vector<16x20xf32> -> vector<16x20xf32>
    %c0_3 = arith.constant 0 : index
    %c0_4 = arith.constant 0 : index
    %3 = vector.load %arg3[%c0_3, %c0_4] : memref<1x20xf32, #tpu.memory_space<vmem>>, vector<1x20xf32>
    %4 = vector.broadcast %3 : vector<1x20xf32> to vector<16x20xf32>
    %5 = arith.addf %2, %4 : vector<16x20xf32>
    %6 = arith.negf %5 : vector<16x20xf32>
    %7 = math.exp %6 : vector<16x20xf32>
    %cst_5 = arith.constant 1.000000e+00 : f32
    %8 = vector.broadcast %cst_5 : f32 to vector<16x20xf32>
    %9 = arith.addf %8, %7 : vector<16x20xf32>
    %10 = arith.divf %8, %9 : vector<16x20xf32>
    %c0_6 = arith.constant 0 : index
    %c0_7 = arith.constant 0 : index
    %11 = vector.load %arg4[%c0_6, %c0_7] : memref<20x10xf32, #tpu.memory_space<vmem>>, vector<20x10xf32>
    %cst_8 = arith.constant dense<0.000000e+00> : vector<16x10xf32>
    %12 = tpu.matmul %10, %11, %cst_8 {dimension_numbers = #tpu.dot_dimension_numbers<[1], [0], [0], [1], [0, 0, 1, 1], [], []>} : vector<16x20xf32>, vector<20x10xf32>, vector<16x10xf32> -> vector<16x10xf32>
    %c0_9 = arith.constant 0 : index
    %c0_10 = arith.constant 0 : index
    %13 = vector.load %arg5[%c0_9, %c0_10] : memref<1x10xf32, #tpu.memory_space<vmem>>, vector<1x10xf32>
    %14 = vector.broadcast %13 : vector<1x10xf32> to vector<16x10xf32>
    %15 = arith.addf %12, %14 : vector<16x10xf32>
    %16 = arith.negf %15 : vector<16x10xf32>
    %17 = math.exp %16 : vector<16x10xf32>
    %cst_11 = arith.constant 1.000000e+00 : f32
    %18 = vector.broadcast %cst_11 : f32 to vector<16x10xf32>
    %19 = arith.addf %18, %17 : vector<16x10xf32>
    %20 = arith.divf %18, %19 : vector<16x10xf32>
    %c0_12 = arith.constant 0 : index
    %c0_13 = arith.constant 0 : index
    %21 = vector.load %arg6[%c0_12, %c0_13] : memref<10x10xf32, #tpu.memory_space<vmem>>, vector<10x10xf32>
    %cst_14 = arith.constant dense<0.000000e+00> : vector<16x10xf32>
    %22 = tpu.matmul %20, %21, %cst_14 {dimension_numbers = #tpu.dot_dimension_numbers<[1], [0], [0], [1], [0, 0, 1, 1], [], []>} : vector<16x10xf32>, vector<10x10xf32>, vector<16x10xf32> -> vector<16x10xf32>
    %c0_15 = arith.constant 0 : index
    %c0_16 = arith.constant 0 : index
    %23 = vector.load %arg7[%c0_15, %c0_16] : memref<1x10xf32, #tpu.memory_space<vmem>>, vector<1x10xf32>
    %24 = vector.broadcast %23 : vector<1x10xf32> to vector<16x10xf32>
    %25 = arith.addf %22, %24 : vector<16x10xf32>
    %26 = arith.negf %25 : vector<16x10xf32>
    %27 = math.exp %26 : vector<16x10xf32>
    %cst_17 = arith.constant 1.000000e+00 : f32
    %28 = vector.broadcast %cst_17 : f32 to vector<16x10xf32>
    %29 = arith.addf %28, %27 : vector<16x10xf32>
    %30 = arith.divf %28, %29 : vector<16x10xf32>
    %c0_18 = arith.constant 0 : index
    %c0_19 = arith.constant 0 : index
    %31 = vector.load %arg8[%c0_18, %c0_19] : memref<10x20xf32, #tpu.memory_space<vmem>>, vector<10x20xf32>
    %cst_20 = arith.constant dense<0.000000e+00> : vector<16x20xf32>
    %32 = tpu.matmul %30, %31, %cst_20 {dimension_numbers = #tpu.dot_dimension_numbers<[1], [0], [0], [1], [0, 0, 1, 1], [], []>} : vector<16x10xf32>, vector<10x20xf32>, vector<16x20xf32> -> vector<16x20xf32>
    %c0_21 = arith.constant 0 : index
    %c0_22 = arith.constant 0 : index
    %33 = vector.load %arg9[%c0_21, %c0_22] : memref<1x20xf32, #tpu.memory_space<vmem>>, vector<1x20xf32>
    %34 = vector.broadcast %33 : vector<1x20xf32> to vector<16x20xf32>
    %35 = arith.addf %32, %34 : vector<16x20xf32>
    %36 = arith.negf %35 : vector<16x20xf32>
    %37 = math.exp %36 : vector<16x20xf32>
    %cst_23 = arith.constant 1.000000e+00 : f32
    %38 = vector.broadcast %cst_23 : f32 to vector<16x20xf32>
    %39 = arith.addf %38, %37 : vector<16x20xf32>
    %40 = arith.divf %38, %39 : vector<16x20xf32>
    %c0_24 = arith.constant 0 : index
    %c0_25 = arith.constant 0 : index
    %41 = vector.load %arg10[%c0_24, %c0_25] : memref<20x256xbf16, #tpu.memory_space<vmem>>, vector<20x256xbf16>
    %42 = arith.truncf %40 : vector<16x20xf32> to vector<16x20xbf16>
    %cst_26 = arith.constant dense<0.000000e+00> : vector<16x256xf32>
    %43 = tpu.matmul %42, %41, %cst_26 {dimension_numbers = #tpu.dot_dimension_numbers<[1], [0], [0], [1], [0, 0, 1, 1], [], []>} : vector<16x20xbf16>, vector<20x256xbf16>, vector<16x256xf32> -> vector<16x256xf32>
    %c0_27 = arith.constant 0 : index
    %c0_28 = arith.constant 0 : index
    %44 = vector.load %arg11[%c0_27, %c0_28] : memref<1x256xf32, #tpu.memory_space<vmem>>, vector<1x256xf32>
    %45 = vector.broadcast %44 : vector<1x256xf32> to vector<16x256xf32>
    %46 = arith.addf %43, %45 : vector<16x256xf32>
    %47 = arith.truncf %46 : vector<16x256xf32> to vector<16x256xbf16>
    %c0_29 = arith.constant 0 : index
    %c0_30 = arith.constant 0 : index
    %48 = vector.load %arg12[%c0_29, %c0_30] : memref<16x256xbf16, #tpu.memory_space<vmem>>, vector<16x256xbf16>
    tpu.vector_store %arg12[%c0_29, %c0_30], %47 {strides = array<i32>} : memref<16x256xbf16, #tpu.memory_space<vmem>>, vector<16x256xbf16>,
    return
  }
  func.func @transform_0(%arg0: i32) -> (i32, i32) {
    %c0_i32 = arith.constant 0 : i32
    %c0_i32_0 = arith.constant 0 : i32
    return %arg0, %c0_i32 : i32, i32
  }
  func.func @transform_1(%arg0: i32) -> (i32, i32) {
    %c0_i32 = arith.constant 0 : i32
    %c0_i32_0 = arith.constant 0 : i32
    %c0_i32_1 = arith.constant 0 : i32
    return %c0_i32, %c0_i32_0 : i32, i32
  }
  func.func @transform_2(%arg0: i32) -> (i32, i32) {
    %c0_i32 = arith.constant 0 : i32
    %c0_i32_0 = arith.constant 0 : i32
    %c0_i32_1 = arith.constant 0 : i32
    return %c0_i32, %c0_i32_0 : i32, i32
  }
  func.func @transform_3(%arg0: i32) -> (i32, i32) {
    %c0_i32 = arith.constant 0 : i32
    %c0_i32_0 = arith.constant 0 : i32
    %c0_i32_1 = arith.constant 0 : i32
    return %c0_i32, %c0_i32_0 : i32, i32
  }
  func.func @transform_4(%arg0: i32) -> (i32, i32) {
    %c0_i32 = arith.constant 0 : i32
    %c0_i32_0 = arith.constant 0 : i32
    %c0_i32_1 = arith.constant 0 : i32
    return %c0_i32, %c0_i32_0 : i32, i32
  }
  func.func @transform_5(%arg0: i32) -> (i32, i32) {
    %c0_i32 = arith.constant 0 : i32
    %c0_i32_0 = arith.constant 0 : i32
    %c0_i32_1 = arith.constant 0 : i32
    return %c0_i32, %c0_i32_0 : i32, i32
  }
  func.func @transform_6(%arg0: i32) -> (i32, i32) {
    %c0_i32 = arith.constant 0 : i32
    %c0_i32_0 = arith.constant 0 : i32
    %c0_i32_1 = arith.constant 0 : i32
    return %c0_i32, %c0_i32_0 : i32, i32
  }
  func.func @transform_7(%arg0: i32) -> (i32, i32) {
    %c0_i32 = arith.constant 0 : i32
    %c0_i32_0 = arith.constant 0 : i32
    %c0_i32_1 = arith.constant 0 : i32
    return %c0_i32, %c0_i32_0 : i32, i32
  }
  func.func @transform_8(%arg0: i32) -> (i32, i32) {
    %c0_i32 = arith.constant 0 : i32
    %c0_i32_0 = arith.constant 0 : i32
    %c0_i32_1 = arith.constant 0 : i32
    return %c0_i32, %c0_i32_0 : i32, i32
  }
  func.func @transform_9(%arg0: i32) -> (i32, i32) {
    %c0_i32 = arith.constant 0 : i32
    %c0_i32_0 = arith.constant 0 : i32
    %c0_i32_1 = arith.constant 0 : i32
    return %c0_i32, %c0_i32_0 : i32, i32
  }
  func.func @transform_10(%arg0: i32) -> (i32, i32) {
    %c0_i32 = arith.constant 0 : i32
    %c0_i32_0 = arith.constant 0 : i32
    %c0_i32_1 = arith.constant 0 : i32
    return %c0_i32, %c0_i32_0 : i32, i32
  }
  func.func @transform_11(%arg0: i32) -> (i32, i32) {
    %c0_i32 = arith.constant 0 : i32
    %c0_i32_0 = arith.constant 0 : i32
    return %arg0, %c0_i32 : i32, i32
  }
}

</mosaic_0001>

<bundles_post_ra>
// kernel: tpu_custom_call.1
= control target key start
LH: loop header
LB: loop body
LE: loop exit
PB: predicated region body
PF: predicated region fallthrough
CT: control target
= control target key end

     0   :  { %s1041_s0 = inlined_call_operand.vmem [shape: bf16[16,256], index: 0, kind: input, shape index: {}]   ;;  %s1042_s1 = inlined_call_operand.vmem [shape: bf16[256,20], index: 1, kind: input, shape index: {}]   ;;  %s1043_s2 = inlined_call_operand.vmem [shape: f32[1,20], index: 2, kind: input, shape index: {}]   ;;  %s1044_s3 = inlined_call_operand.vmem [shape: f32[20,10], index: 3, kind: input, shape index: {}]   ;;  %s1045_s4 = inlined_call_operand.vmem [shape: f32[1,10], index: 4, kind: input, shape index: {}]   ;;  %s1046_s5 = inlined_call_operand.vmem [shape: f32[10,10], index: 5, kind: input, shape index: {}]   ;;  %s1047_s6 = inlined_call_operand.vmem [shape: f32[1,10], index: 6, kind: input, shape index: {}]   ;;  %s1048_s7 = inlined_call_operand.vmem [shape: f32[10,20], index: 7, kind: input, shape index: {}]   ;;  %s1049_s8 = inlined_call_operand.vmem [shape: f32[1,20], index: 8, kind: input, shape index: {}]   ;;  %s1050_s9 = inlined_call_operand.vmem [shape: bf16[20,256], index: 9, kind: input, shape index: {}]   ;;  %s1051_s10 = inlined_call_operand.vmem [shape: f32[1,256], index: 10, kind: input, shape index: {}]   ;;  %s1052_s11 = inlined_call_operand.hbm [shape: bf16[16,256], index: 11, kind: output, shape index: {}]  }
   0x1   :  { %v784_v0 = vld [vmem:[%s1042_s1 + $0x78] sm:$0xff]   ;;  %v786_v2 = vld [vmem:[%s1042_s1 + $0x70] sm:$0xff]   ;;  %v788_v4 = vld [vmem:[%s1042_s1 + $0x68] sm:$0xff]  }
   0x2   :  { %v785_v1 = vld [vmem:[%s1042_s1 + $0x38] sm:$0xff]   ;;  %722 = vmatprep.subr.bf16.mxu0 %v784_v0  ;;  %v787_v3 = vld [vmem:[%s1042_s1 + $0x30] sm:$0xff]   ;;  %v789_v5 = vld [vmem:[%s1042_s1 + $0x28] sm:$0xff]  }
   0x3   :  { %723 = vmatpush3.bf16.msra.mxu0 %v785_v1  ;;  %v790_v6 = vld [vmem:[%s1042_s1 + $0x60] sm:$0xff]   ;;  %v792_v8 = vld [vmem:[%s1042_s1 + $0x58] sm:$0xff]   ;;  %v794_v10 = vld [vmem:[%s1042_s1 + $0x50] sm:$0xff]  }
   0x4   :  { %724 = vmatprep.subr.bf16.mxu0 %v786_v2  ;;  %v791_v7 = vld [vmem:[%s1042_s1 + $0x20] sm:$0xff]   ;;  %v793_v9 = vld [vmem:[%s1042_s1 + $0x18] sm:$0xff]  }
   0x5   :  { %v802_v11 = vld [vmem:[%s1041_s0 + $0x4] ss:$8 sps:$4 sm:$0xff]  }
   0x7   :  { %725 = vmatpush3.bf16.msra.mxu0 %v787_v3 }
   0x8   :  { %726 = vmatprep.subr.bf16.mxu0 %v788_v4 }
   0xb   :  { %727 = vmatpush3.bf16.msra.mxu0 %v789_v5 }
   0xc   :  { %728 = vmatprep.subr.bf16.mxu0 %v790_v6 }
   0xf   :  { %729 = vmatpush3.bf16.msra.mxu0 %v791_v7 }
  0x10   :  { %730 = vmatprep.subr.bf16.mxu0 %v792_v8 }
  0x11   :  { %16 = vsyncpa [#allocation3], 0  ;;  %v795_v12 = vld [vmem:[%s1042_s1 + $0x10] sm:$0xff]   ;;  %219 = vmatprep.mubr.bf16.mxu0 %v802_v11  ;;  %v796_v13 = vld [vmem:[%s1042_s1 + $0x48] sm:$0xff]   ;;  %vm257_vm0 = vcmask 1043456   ;;  %vm250_vm1 = vcmask 162816  }
  0x12   :  { %v797_v14 = vld [vmem:[%s1042_s1 + $0x8] sm:$0xff]   ;;  %v798_v15 = vld [vmem:[%s1042_s1 + $0x40] sm:$0xff]   ;;  %v242_v18 = vld [vmem:[%s1044_s3 + $0x10] sm:$0xf]  ;;  %vm364_vm2 = vcmask 1041408   ;;  %vm357_vm3 = vcmask 80896  }
  0x13   :  { %731 = vmatpush3.bf16.msra.mxu0 %v793_v9  ;;  %v799_v16 = vld [vmem:[%s1042_s1] sm:$0xff]   ;;  %v241_v19 = vld [vmem:[%s1044_s3 + $0x8] sm:$0xff]  ;;  %757 = vmatprep.subr.msk.mxu1 %vm257_vm0, %v242_v18  ;;  %v562_v4 = vld [vmem:[%s1050_s9 + $0x10] sm:$0x33]  ;;  %v862_v8 = vmov 0   ;;  %s863_s16 = smov [#allocation2]  }
  0x14   :  { %732 = vmatprep.subr.bf16.mxu0 %v794_v10  ;;  %v800_v17 = vld [vmem:[%s1041_s0] ss:$8 sps:$4 sm:$0xff]   ;;  %758 = vmatpush3.msk.msra.mxu1 %vm257_vm0, %v242_v18  ;;  %v715_v5 = vcombine.high %v562_v4, %v562_v4  ;;  %v714_v6 = vcombine.low %v562_v4, %v562_v4  ;;  %v807_v7 = vld [vmem:[%s1050_s9 + $0x4] ss:$8 sps:$4 sm:$0xff]   ;;  %s662_s17 = sshll.u32 %s863_s16, 4  ;;  %s663_s17 = int_to_ptr.vmem [resolvable:$true] %s662_s17 }
  0x15   :  { %759 = vmatprep.subr.mxu1 %v241_v19  ;;  %v240_v20 = vld [vmem:[%s1044_s3] sm:$0xff]  ;;  %v349_v38 = vld [vmem:[%s1046_s5 + $0x8] sm:$0x3]  ;;  %s840_s18 = scalar_lea.vmem %s663_s17, 256  ;;  %p845_p1 = scmp.lt.s32.totalorder %s663_s17, %s663_s17 }
  0x16   :  { %760 = vmatpush3.msra.mxu1 %v241_v19  ;;  %v673_v22 = vld [vmem:[%s1043_s2] ss:$0 sm:$0xff]  ;;  %v456_v53 = vld [vmem:[%s1048_s7 + $0x8] sm:$0x3]  ;;  %v595_v9 = vsel %vm364_vm2, %v714_v6, 0  ;;  %p841_p0 = scmp.ne.s32.totalorder %s663_s17, %s840_s18  ;;  %p846_p2 = scmp.lt.s32.totalorder %s840_s18, %s840_s18 }
  0x17   :  { %733 = vmatpush3.bf16.msra.mxu0 %v795_v12  ;;  %761 = vmatprep.subr.mxu1 %v240_v20  ;;  %v348_v39 = vld [vmem:[%s1046_s5] sm:$0xff] }
  0x18   :  { %734 = vmatprep.subr.bf16.mxu0 %v796_v13  ;;  %762 = vmatpush3.msra.mxu1 %v240_v20  ;;  %v694_v40 = vld [vmem:[%s1045_s4] ss:$0 sm:$0xff]  ;;  %p847_p3 = por %p846_p2, %p845_p1 }
  0x19   :  { %766 = vmatprep.subr.msk.mxu1 %vm364_vm2, %v349_v38  ;;  %v455_v54 = vld [vmem:[%s1048_s7] sm:$0xff] }
  0x1a   :  { %v700_v55 = vld [vmem:[%s1047_s6] ss:$0 sm:$0xff]  ;;  %p848_p4 = pnand %p847_p3, %p841_p0 }
  0x1b   :  { %735 = vmatpush3.bf16.msra.mxu0 %v797_v14  ;;  %v805_v10 = vld [vmem:[%s1050_s9] ss:$8 sps:$4 sm:$0xff]  }
  0x1c   :  { %736 = vmatprep.subr.bf16.mxu0 %v798_v15  ;;  %v706_v11 = vld [vmem:[%s1049_s8] ss:$0 sm:$0xff] }
  0x1f   :  { %737 = vmatpush3.bf16.msra.mxu0 %v799_v16 }
  0x22   :  { %220 = vmatmul.mubr.bf16.vlgmr.msra.gmra.mxu0 %v800_v17 }
  0xe2   :  { %v738_v21 = vpop.f32.mrf.mxu0 }
  0xe4   :  { %v739_v23 = vpop.f32.mrf.mxu0 }
  0xe5   :  { %v740_v24 = vadd.f32 %v739_v23, %v738_v21 }
  0xe6   :  { %v741_v25 = vpop.f32.mrf.mxu0 }
  0xe7   :  { %v222_v26 = vadd.f32 %v740_v24, %v673_v22 }
  0xe8   :  { %v742_v27 = vpop.f32.mrf.mxu0 }
  0xe9   :  { %v692_v28 = vmul.f32 -1.442695, %v222_v26  ;;  %v743_v29 = vadd.f32 %v742_v27, %v741_v25  ;;  %v566_v25 = vlaneseq }
  0xeb   :  { %808 = vpow2.f32 %v692_v28  ;;  %v225_v30 = vadd.f32 %v743_v29, %v673_v22  ;;  %v567_v26 = vshrl.u32 %v566_v25, 7  ;;  %v564_v29 = vld [vmem:[%s1051_s10] sm:$0x3] }
  0xed   :  { %v693_v31 = vmul.f32 -1.442695, %v225_v30  ;;  %v568_v27 = vsub.s32 0, %v567_v26  ;;  %v572_v28 = vsub.s32 1, %v567_v26 }
  0xef   :  { %810 = vpow2.f32 %v693_v31  ;;  %v569_v30 = vrot.slane %v564_v29, %v568_v27  ;;  %v573_v31 = vrot.slane %v564_v29, %v572_v28 }
  0xf8   :  { %v809_v32 = vpop.eup %808 }
  0xf9   :  { %v234_v33 = vadd.f32 1.0, %v809_v32 }
  0xfb   :  { %812 = vrcp.f32 %v234_v33 }
  0xfc   :  { %v811_v34 = vpop.eup %810 }
  0xfd   :  { %v235_v35 = vadd.f32 1.0, %v811_v34 }
  0xff   :  { %814 = vrcp.f32 %v235_v35 }
 0x108   :  { %v813_v36 = vpop.eup %812 }
 0x109   :  { %763 = vmatprep.mubr.msk.f32.mxu1 %vm250_vm1, %v813_v36 }
 0x10c   :  { %v815_v37 = vpop.eup %814 }
 0x10d   :  { %764 = vmatmul.mubr.msk.f32.vlgmr.msra.gmra.mxu1 %vm250_vm1, %v815_v37 }
 0x10e   :  { %767 = vmatpush3.msk.msra.mxu1 %vm364_vm2, %v349_v38 }
 0x10f   :  { %768 = vmatprep.subr.mxu1 %v348_v39 }
 0x110   :  { %769 = vmatpush3.msra.mxu1 %v348_v39 }
 0x111   :  { %773 = vmatprep.subr.msk.mxu1 %vm364_vm2, %v456_v53 }
 0x1cd   :  { %v765_v41 = vpop.f32.mrf.mxu1 }
 0x1ce   :  { %v333_v42 = vadd.f32 %v765_v41, %v694_v40 }
 0x1cf   :  { %v327_v43 = vpop.f32.mrf.mxu1 }
 0x1d0   :  { %v699_v44 = vmul.f32 -1.442695, %v333_v42  ;;  %v328_v45 = vadd.f32 %v694_v40, %v327_v43 }
 0x1d2   :  { %816 = vpow2.f32 %v699_v44  ;;  %v698_v46 = vmul.f32 -1.442695, %v328_v45 }
 0x1d4   :  { %818 = vpow2.f32 %v698_v46 }
 0x1df   :  { %v817_v47 = vpop.eup %816 }
 0x1e0   :  { %v343_v49 = vadd.f32 1.0, %v817_v47 }
 0x1e1   :  { %v819_v48 = vpop.eup %818 }
 0x1e2   :  { %v342_v50 = vadd.f32 1.0, %v819_v48 }
 0x1e4   :  { %820 = vrcp.f32 %v342_v50 }
 0x1e5   :  { %822 = vrcp.f32 %v343_v49 }
 0x1f1   :  { %v821_v51 = vpop.eup %820 }
 0x1f2   :  { %v823_v52 = vpop.eup %822  ;;  %770 = vmatprep.mubr.msk.f32.mxu1 %vm357_vm3, %v821_v51 }
 0x1f3   :  { %771 = vmatmul.mubr.msk.f32.vlgmr.msra.gmra.mxu1 %vm357_vm3, %v823_v52 }
 0x1f4   :  { %774 = vmatpush3.msk.msra.mxu1 %vm364_vm2, %v456_v53 }
 0x1f5   :  { %775 = vmatprep.subr.mxu1 %v455_v54 }
 0x1f6   :  { %776 = vmatpush3.msra.mxu1 %v455_v54 }
 0x1f7   :  { %716 = vmatprep.subr.msk.bf16.mxu1 %vm364_vm2, %v715_v5 }
 0x2b3   :  { %v772_v56 = vpop.f32.mrf.mxu1 }
 0x2b4   :  { %v440_v57 = vadd.f32 %v772_v56, %v700_v55 }
 0x2b5   :  { %v434_v58 = vpop.f32.mrf.mxu1 }
 0x2b6   :  { %v705_v59 = vmul.f32 -1.442695, %v440_v57  ;;  %v435_v60 = vadd.f32 %v700_v55, %v434_v58 }
 0x2b8   :  { %824 = vpow2.f32 %v705_v59  ;;  %v704_v61 = vmul.f32 -1.442695, %v435_v60 }
 0x2ba   :  { %826 = vpow2.f32 %v704_v61 }
 0x2c5   :  { %v825_v62 = vpop.eup %824 }
 0x2c6   :  { %v450_v0 = vadd.f32 1.0, %v825_v62 }
 0x2c7   :  { %v827_v63 = vpop.eup %826 }
 0x2c8   :  { %v449_v1 = vadd.f32 1.0, %v827_v63 }
 0x2ca   :  { %828 = vrcp.f32 %v449_v1 }
 0x2cb   :  { %830 = vrcp.f32 %v450_v0 }
 0x2d7   :  { %v829_v2 = vpop.eup %828 }
 0x2d8   :  { %v831_v3 = vpop.eup %830  ;;  %777 = vmatprep.mubr.msk.f32.mxu1 %vm357_vm3, %v829_v2 }
 0x2d9   :  { %778 = vmatmul.mubr.msk.f32.vlgmr.msra.gmra.mxu1 %vm357_vm3, %v831_v3 }
 0x2da   :  { %632 = vmatprep.mubr.bf16.mxu1 %v862_v8  ;;  %613 = vmatpush1.bf16.msra.mxu1 %v595_v9 }
 0x2db   :  { %614 = vmatprep.subr.bf16.mxu1 %v807_v7 }
 0x2de   :  { %615 = vmatpush1.bf16.msra.mxu1 %v805_v10 }
 0x399   :  { %v779_v12 = vpop.f32.mrf.mxu1 }
 0x39a   :  { %v545_v13 = vadd.f32 %v779_v12, %v706_v11 }
 0x39b   :  { %v539_v14 = vpop.f32.mrf.mxu1 }
 0x39c   :  { %v711_v15 = vmul.f32 -1.442695, %v545_v13  ;;  %v540_v16 = vadd.f32 %v706_v11, %v539_v14 }
 0x39e   :  { %832 = vpow2.f32 %v711_v15  ;;  %v710_v17 = vmul.f32 -1.442695, %v540_v16 }
 0x3a0   :  { %834 = vpow2.f32 %v710_v17 }
 0x3ab   :  { %v833_v18 = vpop.eup %832 }
 0x3ac   :  { %v555_v19 = vadd.f32 1.0, %v833_v18 }
 0x3ad   :  { %v835_v20 = vpop.eup %834 }
 0x3ae   :  { %v554_v21 = vadd.f32 1.0, %v835_v20  ;;  %836 = vrcp.f32 %v555_v19 }
 0x3b0   :  { %838 = vrcp.f32 %v554_v21 }
 0x3bb   :  { %v837_v22 = vpop.eup %836 }
 0x3bd   :  { %v839_v23 = vpop.eup %838 }
 0x3be   :  { %v563_v24 = vpack.c.bf16 %v837_v22, %v839_v23 }
 0x3c0   :  { %717 = vmatmul.mubr.msk.bf16.vlgmr.msra.gmra.mxu1 %vm250_vm1, %v563_v24 }
 0x480   :  { %v634_v32 = vpop.f32.mrf.mxu1 }
 0x481   :  { %v635_v34 = vadd.f32 %v634_v32, %v569_v30 }
 0x482   :  { %v636_v33 = vpop.f32.mrf.mxu1 }
 0x483   :  { %v637_v35 = vadd.f32 %v636_v33, %v573_v31 }
 0x484   :  { %v638_v36 = vpop.f32.mrf.mxu1 }
 0x485   :  { %v720_v37 = vpack.c.bf16 %v637_v35, %v635_v34  ;;  %v639_v39 = vadd.f32 %v638_v36, %v569_v30 }
 0x486   :  { %v640_v38 = vpop.f32.mrf.mxu1 }
 0x487   :  { %655 = vst [vmem:[#allocation2] sm:$0xff] %v720_v37  ;;  %v641_v40 = vadd.f32 %v640_v38, %v573_v31 }
 0x489   :  { %v721_v41 = vpack.c.bf16 %v641_v40, %v639_v39 }
 0x48b   :  { %656 = vst [vmem:[#allocation2 + $0x8] sm:$0xff] %v721_v41 }
 0x48c   :  { %851 = shalt.err (!%p848_p4)
}
 0x48d   :  { %s864_s10 = smov 128   ;;  %s865_s1 = smov 8  }
 0x48e   :  { %668 = dma.vmem_to_hbm [thread:$0]  %s663_s17, 256, %s1052_s11, [#allocation3], %s864_s10, %s864_s10, %s865_s1  }
 0x48f   :  { %860 = dma.done.wait [#allocation3], 256  }
 0x490   :  { %861 = vsyncadd [#allocation3], 4294967040 }
 0x491   :  { %672 = vsyncpa [#allocation3], 1 }

</bundles_post_ra>
